<compile_context>
chip_gen: v6e
topology: v6e:2x2x1
jax: 0.10.0
libtpu: 0.0.40
codegen_flags: <defaults>
</compile_context>

<pallas_src>
import numpy as np
import jax
import jax.numpy as jnp
from jax import lax
from jax.experimental import pallas as pl
from jax.experimental.pallas import tpu as pltpu

KERNEL_SIZES = (3, 4, 5)
MAX_K = max(KERNEL_SIZES)


def _round_up(x, m):
    return -(-x // m) * m


# ----------------------------------------------------------------------------
# Kernel 1: fused conv(3/4/5) (as one im2col matmul) + bias + relu + linear,
#           tiled over the time dimension.
# ----------------------------------------------------------------------------
def _conv_relu_linear_kernel(xc_ref, w_ref, bfeat_ref, wl_ref, bl_ref, o_ref):
    # One fat MXU matmul: K = MAX_K * C_in (im2col), f32 accumulation.
    feat = jnp.dot(xc_ref[...], w_ref[...], preferred_element_type=jnp.float32)
    feat = jnp.maximum(feat + bfeat_ref[...], 0.0)          # conv bias + relu (f32)
    out = jnp.dot(feat.astype(wl_ref.dtype), wl_ref[...],   # bf16 MXU operands
                  preferred_element_type=jnp.float32) + bl_ref[...]
    o_ref[...] = out.astype(o_ref.dtype)


def conv_relu_linear(x_col, w_col, bfeat, wl, bl, tile_t, t_out_pad):
    _, k5c = x_col.shape
    feat_pad = w_col.shape[1]
    out_pad = wl.shape[1]
    const = pl.Buffered(1)   # single-buffer the grid-invariant operands

    # Explicit scoped-VMEM budget: double-buffered x/out tiles + single-buffered
    # weights/biases, with headroom (defaults are only 16/32 MiB).
    need = (2 * (tile_t * k5c * x_col.dtype.itemsize + tile_t * out_pad * 4)
            + k5c * feat_pad * w_col.dtype.itemsize
            + feat_pad * out_pad * wl.dtype.itemsize
            + (feat_pad + out_pad) * 4)
    vmem_limit = int(min(64 * 2**20, max(32 * 2**20, 2 * need + 4 * 2**20)))

    return pl.pallas_call(
        _conv_relu_linear_kernel,
        out_shape=jax.ShapeDtypeStruct((t_out_pad, out_pad), jnp.float32),
        grid=(t_out_pad // tile_t,),
        in_specs=[
            pl.BlockSpec((tile_t, k5c), lambda i: (i, 0)),
            pl.BlockSpec((k5c, feat_pad), lambda i: (0, 0), pipeline_mode=const),
            pl.BlockSpec((1, feat_pad), lambda i: (0, 0), pipeline_mode=const),
            pl.BlockSpec((feat_pad, out_pad), lambda i: (0, 0), pipeline_mode=const),
            pl.BlockSpec((1, out_pad), lambda i: (0, 0), pipeline_mode=const),
        ],
        out_specs=pl.BlockSpec((tile_t, out_pad), lambda i: (i, 0)),
        compiler_params=pltpu.CompilerParams(
            dimension_semantics=("parallel",),
            vmem_limit_bytes=vmem_limit),
    )(x_col, w_col, bfeat, wl, bl)


# ----------------------------------------------------------------------------
# Kernel 2: residual (pre-norm layer_norm without affine) + masked_fill
# ----------------------------------------------------------------------------
def _residual_ln_mask_kernel(emb_ref, x_ref, mask_ref, o_ref):
    x = x_ref[...]
    d = x.shape[-1]
    inv_d = 1.0 / d
    mean = jnp.sum(x, axis=-1, keepdims=True) * inv_d
    var = jnp.sum(x * x, axis=-1, keepdims=True) * inv_d - mean * mean
    normed = (x - mean) * lax.rsqrt(var + 1e-5)              # F.layer_norm eps
    out = (emb_ref[...] + normed) * mask_ref[...]            # residual + mask
    o_ref[...] = out.astype(o_ref.dtype)


def residual_ln_mask(emb2d, x2d, maskf2d, bm):
    n, d = emb2d.shape
    need = 2 * (3 * bm * d * 4 + bm * 4)                     # double-buffered
    vmem_limit = int(min(64 * 2**20, max(32 * 2**20, 2 * need + 4 * 2**20)))
    return pl.pallas_call(
        _residual_ln_mask_kernel,
        out_shape=jax.ShapeDtypeStruct((n, d), jnp.float32),
        grid=(n // bm,),
        in_specs=[
            pl.BlockSpec((bm, d), lambda i: (i, 0)),
            pl.BlockSpec((bm, d), lambda i: (i, 0)),
            pl.BlockSpec((bm, 1), lambda i: (i, 0)),
        ],
        out_specs=pl.BlockSpec((bm, d), lambda i: (i, 0)),
        compiler_params=pltpu.CompilerParams(
            dimension_semantics=("parallel",),
            vmem_limit_bytes=vmem_limit),
    )(emb2d, x2d, maskf2d)


# ----------------------------------------------------------------------------
# Parameter init (deterministic, PyTorch-default-like uniform) + fused layouts
# ----------------------------------------------------------------------------
def init_params(key, input_size, output_size=None, out_channels=None):
    out_channels = input_size if out_channels is None else out_channels
    output_size = input_size if output_size is None else output_size
    keys = jax.random.split(key, 2 * len(KERNEL_SIZES) + 2)

    def u(k, shape, fan_in):
        bound = 1.0 / np.sqrt(fan_in)
        return jax.random.uniform(k, shape, jnp.float32, -bound, bound)

    p = {"out_size": int(output_size), "out_channels": int(out_channels),
         "input_size": int(input_size)}
    for i, ks in enumerate(KERNEL_SIZES):
        # tap-major weight layout (k, C_in, C_out), raw f32 kept for reference
        p[f"w{ks}"] = u(keys[2 * i], (ks, input_size, out_channels),
                        input_size * ks)
        p[f"b{ks}"] = u(keys[2 * i + 1], (out_channels,), input_size * ks)
    in_feat = out_channels * len(KERNEL_SIZES)
    p["wl_raw"] = u(keys[-2], (in_feat, output_size), in_feat)   # (in, out)
    p["bl_raw"] = u(keys[-1], (output_size,), in_feat)

    # ---- fused, lane-dense layouts consumed by kernel 1 ----
    left_pad = MAX_K // 2
    feat_pad = _round_up(in_feat, 128)
    out_pad = _round_up(output_size, 128)
    w_taps = jnp.zeros((MAX_K, input_size, feat_pad), jnp.float32)
    col = 0
    for ks in KERNEL_SIZES:
        off = left_pad - ks // 2     # aligns each branch to its PyTorch slicing
        w_taps = w_taps.at[off:off + ks, :, col:col + out_channels].set(
            p[f"w{ks}"])
        col += out_channels
    # im2col weight: (MAX_K*C_in, feat_pad); row j*C_in + c <-> (tap j, chan c)
    p["w_col"] = w_taps.reshape(MAX_K * input_size, feat_pad).astype(jnp.bfloat16)
    bfeat = jnp.concatenate([p[f"b{ks}"] for ks in KERNEL_SIZES])
    p["bfeat"] = jnp.zeros((1, feat_pad), jnp.float32).at[0, :in_feat].set(bfeat)
    p["wl"] = (jnp.zeros((feat_pad, out_pad), jnp.float32)
               .at[:in_feat, :output_size].set(p["wl_raw"])).astype(jnp.bfloat16)
    p["bl"] = (jnp.zeros((1, out_pad), jnp.float32)
               .at[0, :output_size].set(p["bl_raw"]))
    return p


# ----------------------------------------------------------------------------
# Forward pass (mirrors TextCnn.forward)
# ----------------------------------------------------------------------------
def text_cnn_forward(params, embeddings, mask_np):
    # mask must be a concrete boolean array: the PyTorch module uses boolean-mask
    # indexing (data-dependent shapes); gather/scatter indices are computed on
    # the host and the heavy math runs in Pallas. Assumes left-aligned masks
    # (the module's intended padded-sequence usage).
    out_size = params["out_size"]
    n_samples, n_words, dim = embeddings.shape
    if 0 in embeddings.shape:
        return jnp.zeros((n_samples, n_words, out_size), embeddings.dtype)

    left_pad = MAX_K // 2
    right_pad = (MAX_K - 1) // 2
    n_words_with_pad = n_words + left_pad + right_pad

    mask_np = np.asarray(mask_np, dtype=bool)
    padded_x = jnp.pad(embeddings.astype(jnp.float32),
                       ((0, 0), (left_pad, right_pad), (0, 0)))
    padded_mask = np.pad(mask_np, ((0, 0), (left_pad + right_pad, 0)),
                         constant_values=True)

    gather_idx = np.nonzero(padded_mask.reshape(-1))[0]
    t = int(gather_idx.shape[0])
    t_out = t - (left_pad + right_pad)

    if t_out <= 0:
        x = jnp.zeros((n_samples, n_words, out_size), jnp.float32)
    else:
        flat_x = padded_x.reshape(-1, dim)[gather_idx]            # (T, dim)
        feat_pad = params["w_col"].shape[1]
        out_pad = params["wl"].shape[1]

        # tile over time; aim for >=2 grid steps (v7x has 2 TensorCores), cap 512
        tile_t = max(8, min(512, _round_up(-(-t_out // 2), 8)))
        # shrink tile if the estimated VMEM working set would get too large
        while tile_t > 64 and (
                2 * tile_t * (MAX_K * dim * 2 + out_pad * 4)
                + MAX_K * dim * feat_pad * 2
                + feat_pad * out_pad * 2) > 48 * 2**20:
            tile_t = max(64, _round_up(tile_t // 2, 8))
        t_out_pad = _round_up(t_out, tile_t)

        # host-side im2col: x_col[i] = concat(flat_x[i+0..i+MAX_K-1]); padded
        # tail rows are zeros, never influence valid rows, sliced off below.
        x_pad = (jnp.zeros((t_out_pad + MAX_K - 1, dim), jnp.float32)
                 .at[:t].set(flat_x))
        x_col = jnp.concatenate(
            [x_pad[j:j + t_out_pad] for j in range(MAX_K)],
            axis=-1).astype(jnp.bfloat16)

        flat_out = conv_relu_linear(
            x_col, params["w_col"], params["bfeat"], params["wl"],
            params["bl"], tile_t, t_out_pad)[:t_out, :out_size]

        # scatter back: replicates `x[flat_mask] = flat_x` from the PyTorch code
        # TODO(synk): fold this scatter into kernel 1 via scalar-prefetched row
        # indices so the conv output never round-trips HBM.
        flat_mask = padded_mask.copy()
        flat_mask[-1, int(padded_mask[-1].sum()) - right_pad:] = False
        flat_mask[0, :left_pad] = False
        scatter_idx = np.nonzero(flat_mask.reshape(-1))[0]
        assert scatter_idx.shape[0] == t_out

        x_full = jnp.zeros((n_samples * n_words_with_pad, out_size), jnp.float32)
        x_full = x_full.at[scatter_idx].set(flat_out)
        x = (x_full.reshape(n_samples, n_words_with_pad, out_size)
             [:, left_pad:-right_pad])

    # residual (pre-norm) + masked fill, fused into the second Pallas kernel
    n_rows = n_samples * n_words
    bm = min(1024, _round_up(n_rows, 8))
    # keep kernel 2's double-buffered working set comfortably inside VMEM
    while bm > 8 and 8 * bm * dim * 4 > 40 * 2**20:
        bm = max(8, _round_up(bm // 2, 8))
    n_rows_pad = _round_up(n_rows, bm)
    emb2d = embeddings.reshape(n_rows, dim).astype(jnp.float32)
    x2d = x.reshape(n_rows, out_size)
    maskf = jnp.asarray(mask_np.reshape(n_rows, 1).astype(np.float32))
    if n_rows_pad != n_rows:
        pad = n_rows_pad - n_rows
        emb2d = jnp.pad(emb2d, ((0, pad), (0, 0)))
        x2d = jnp.pad(x2d, ((0, pad), (0, 0)))
        maskf = jnp.pad(maskf, ((0, pad), (0, 0)))
    out2d = residual_ln_mask(emb2d, x2d, maskf, bm)[:n_rows]
    return out2d.reshape(n_samples, n_words, out_size)


# ----------------------------------------------------------------------------
# Pure-numpy reference (mirrors the PyTorch module), used only for validation
# ----------------------------------------------------------------------------
def reference_forward(p, embeddings, mask_np):
    out_size = p["out_size"]
    emb = np.asarray(embeddings, np.float32)
    n_samples, n_words, dim = emb.shape
    left_pad, right_pad = MAX_K // 2, (MAX_K - 1) // 2
    mask = np.asarray(mask_np, bool)
    padded_x = np.pad(emb, ((0, 0), (left_pad, right_pad), (0, 0)))
    padded_mask = np.pad(mask, ((0, 0), (left_pad + right_pad, 0)),
                         constant_values=True)
    flat_x = padded_x.reshape(-1, dim)[padded_mask.reshape(-1)]
    T = flat_x.shape[0]
    t_out = T - (left_pad + right_pad)
    convs = []
    for ks in KERNEL_SIZES:
        w = np.asarray(p[f"w{ks}"]); b = np.asarray(p[f"b{ks}"])
        L = T - ks + 1
        acc = np.zeros((L, w.shape[2]), np.float32)
        for j in range(ks):
            acc += flat_x[j:j + L] @ w[j]
        acc += b
        lo = left_pad - ks // 2
        hi = L - (right_pad - (ks - 1) // 2)
        convs.append(acc[lo:hi])
    feat = np.maximum(np.concatenate(convs, axis=-1), 0.0)
    lin = feat @ np.asarray(p["wl_raw"]) + np.asarray(p["bl_raw"])
    flat_mask = padded_mask.copy()
    flat_mask[-1, int(padded_mask[-1].sum()) - right_pad:] = False
    flat_mask[0, :left_pad] = False
    x_full = np.zeros((n_samples * (n_words + left_pad + right_pad), out_size),
                      np.float32)
    x_full[flat_mask.reshape(-1)] = lin[:t_out]
    x = x_full.reshape(n_samples, -1, out_size)[:, left_pad:-right_pad]
    mean = x.mean(-1, keepdims=True)
    var = x.var(-1, keepdims=True)
    normed = (x - mean) / np.sqrt(var + 1e-5)
    out = (emb + normed) * mask[..., None].astype(np.float32)
    return out


if __name__ == "__main__":
    key = jax.random.PRNGKey(0)
    pkey, ekey = jax.random.split(key)

    input_size = 32
    n_samples, n_words = 2, 8

    params = init_params(pkey, input_size)
    embeddings = jax.random.normal(ekey, (n_samples, n_words, input_size),
                                   jnp.float32)
    # left-aligned boolean mask (standard padded-sequence usage)
    lengths = [n_words, 6]
    mask = np.zeros((n_samples, n_words), dtype=bool)
    for i, L in enumerate(lengths):
        mask[i, :L] = True

    out = text_cnn_forward(params, embeddings, mask)
    out = jax.block_until_ready(out)
    out_np = np.asarray(out)

    assert out.shape == (n_samples, n_words, input_size)
    assert np.all(np.isfinite(out_np))
    # masked positions must be exactly zero (masked_fill_)
    assert np.allclose(out_np[1, 6:], 0.0)
    # compare against the exact-f32 numpy reference (loose tol: bf16 MXU
    # operands + layer-norm amplification)
    ref = reference_forward(params, embeddings, mask)
    assert np.allclose(out_np, ref, atol=7e-2, rtol=7e-2)
    print("KERNEL_OK")
</pallas_src>

<mosaic_0001>
module attributes {stable_mosaic.version = 11 : i64} {
  func.func @_conv_relu_linear_kernel(%arg0: i32, %arg1: memref<16x160xbf16, #tpu.memory_space<vmem>>, %arg2: memref<160x128xbf16, #tpu.memory_space<vmem>>, %arg3: memref<1x128xf32, #tpu.memory_space<vmem>>, %arg4: memref<128x128xbf16, #tpu.memory_space<vmem>>, %arg5: memref<1x128xf32, #tpu.memory_space<vmem>>, %arg6: memref<16x128xf32, #tpu.memory_space<vmem>>) attributes {dimension_semantics = [#tpu.dimension_semantics<parallel>], iteration_bounds = array<i64: 2>, scalar_prefetch = 0 : i64, scratch_operands = 0 : i64, tpu.core_type = #tpu.core_type<tc>, window_params = [{transform_indices = @transform_0, window_bounds = array<i64: 16, 160>}, {pipeline_mode = #tpu.pipeline_mode<synchronous>, transform_indices = @transform_1, window_bounds = array<i64: 160, 128>}, {pipeline_mode = #tpu.pipeline_mode<synchronous>, transform_indices = @transform_2, window_bounds = array<i64: 1, 128>}, {pipeline_mode = #tpu.pipeline_mode<synchronous>, transform_indices = @transform_3, window_bounds = array<i64: 128, 128>}, {pipeline_mode = #tpu.pipeline_mode<synchronous>, transform_indices = @transform_4, window_bounds = array<i64: 1, 128>}, {transform_indices = @transform_5, window_bounds = array<i64: 16, 128>}]} {
    %c0 = arith.constant 0 : index
    %c0_0 = arith.constant 0 : index
    %0 = vector.load %arg1[%c0, %c0_0] : memref<16x160xbf16, #tpu.memory_space<vmem>>, vector<16x160xbf16>
    %c0_1 = arith.constant 0 : index
    %c0_2 = arith.constant 0 : index
    %1 = vector.load %arg2[%c0_1, %c0_2] : memref<160x128xbf16, #tpu.memory_space<vmem>>, vector<160x128xbf16>
    %cst = arith.constant dense<0.000000e+00> : vector<16x128xf32>
    %2 = tpu.matmul %0, %1, %cst {dimension_numbers = #tpu.dot_dimension_numbers<[1], [0], [0], [1], [0, 0, 1, 1], [], []>} : vector<16x160xbf16>, vector<160x128xbf16>, vector<16x128xf32> -> vector<16x128xf32>
    %c0_3 = arith.constant 0 : index
    %c0_4 = arith.constant 0 : index
    %3 = vector.load %arg3[%c0_3, %c0_4] : memref<1x128xf32, #tpu.memory_space<vmem>>, vector<1x128xf32>
    %4 = vector.broadcast %3 : vector<1x128xf32> to vector<16x128xf32>
    %5 = arith.addf %2, %4 : vector<16x128xf32>
    %cst_5 = arith.constant 0.000000e+00 : f32
    %6 = vector.broadcast %cst_5 : f32 to vector<16x128xf32>
    %7 = arith.maximumf %5, %6 : vector<16x128xf32>
    %8 = arith.truncf %7 : vector<16x128xf32> to vector<16x128xbf16>
    %c0_6 = arith.constant 0 : index
    %c0_7 = arith.constant 0 : index
    %9 = vector.load %arg4[%c0_6, %c0_7] : memref<128x128xbf16, #tpu.memory_space<vmem>>, vector<128x128xbf16>
    %cst_8 = arith.constant dense<0.000000e+00> : vector<16x128xf32>
    %10 = tpu.matmul %8, %9, %cst_8 {dimension_numbers = #tpu.dot_dimension_numbers<[1], [0], [0], [1], [0, 0, 1, 1], [], []>} : vector<16x128xbf16>, vector<128x128xbf16>, vector<16x128xf32> -> vector<16x128xf32>
    %c0_9 = arith.constant 0 : index
    %c0_10 = arith.constant 0 : index
    %11 = vector.load %arg5[%c0_9, %c0_10] : memref<1x128xf32, #tpu.memory_space<vmem>>, vector<1x128xf32>
    %12 = vector.broadcast %11 : vector<1x128xf32> to vector<16x128xf32>
    %13 = arith.addf %10, %12 : vector<16x128xf32>
    %c0_11 = arith.constant 0 : index
    %c0_12 = arith.constant 0 : index
    %14 = vector.load %arg6[%c0_11, %c0_12] : memref<16x128xf32, #tpu.memory_space<vmem>>, vector<16x128xf32>
    tpu.vector_store %arg6[%c0_11, %c0_12], %13 {strides = array<i32>} : memref<16x128xf32, #tpu.memory_space<vmem>>, vector<16x128xf32>,
    return
  }
  func.func @transform_0(%arg0: i32) -> (i32, i32) {
    %c0_i32 = arith.constant 0 : i32
    %c0_i32_0 = arith.constant 0 : i32
    return %arg0, %c0_i32 : i32, i32
  }
  func.func @transform_1(%arg0: i32) -> (i32, i32) {
    %c0_i32 = arith.constant 0 : i32
    %c0_i32_0 = arith.constant 0 : i32
    %c0_i32_1 = arith.constant 0 : i32
    return %c0_i32, %c0_i32_0 : i32, i32
  }
  func.func @transform_2(%arg0: i32) -> (i32, i32) {
    %c0_i32 = arith.constant 0 : i32
    %c0_i32_0 = arith.constant 0 : i32
    %c0_i32_1 = arith.constant 0 : i32
    return %c0_i32, %c0_i32_0 : i32, i32
  }
  func.func @transform_3(%arg0: i32) -> (i32, i32) {
    %c0_i32 = arith.constant 0 : i32
    %c0_i32_0 = arith.constant 0 : i32
    %c0_i32_1 = arith.constant 0 : i32
    return %c0_i32, %c0_i32_0 : i32, i32
  }
  func.func @transform_4(%arg0: i32) -> (i32, i32) {
    %c0_i32 = arith.constant 0 : i32
    %c0_i32_0 = arith.constant 0 : i32
    %c0_i32_1 = arith.constant 0 : i32
    return %c0_i32, %c0_i32_0 : i32, i32
  }
  func.func @transform_5(%arg0: i32) -> (i32, i32) {
    %c0_i32 = arith.constant 0 : i32
    %c0_i32_0 = arith.constant 0 : i32
    return %arg0, %c0_i32 : i32, i32
  }
}

</mosaic_0001>

<bundles_post_ra>
// kernel: tpu_custom_call.1
= control target key start
LH: loop header
LB: loop body
LE: loop exit
PB: predicated region body
PF: predicated region fallthrough
CT: control target
= control target key end

     0   :  { %10 = vsyncpa [#allocation3], 0  ;;  %s1208_s0 = inlined_call_operand.hbm [shape: bf16[32,160], index: 0, kind: input, shape index: {}]   ;;  %s1209_s1 = inlined_call_operand.hbm [shape: bf16[160,128], index: 1, kind: input, shape index: {}]   ;;  %s1210_s2 = inlined_call_operand.vmem [shape: f32[1,128], index: 2, kind: input, shape index: {}]   ;;  %s1211_s3 = inlined_call_operand.hbm [shape: bf16[128,128], index: 3, kind: input, shape index: {}]   ;;  %s1212_s4 = inlined_call_operand.vmem [shape: f32[1,128], index: 4, kind: input, shape index: {}]   ;;  %s1213_s5 = inlined_call_operand.hbm [shape: f32[32,128], index: 5, kind: output, shape index: {}]  }
   0x1   :  { %12 = vsyncpa [#allocation3 + $0x1], 0 }
   0x2   :  { %13 = vsyncpa [#allocation6], 0 }
   0x3   :  { %14 = vsyncpa [#allocation4], 0 }
   0x4   :  { %16 = vsyncpa [#allocation4 + $0x1], 0  ;;  %s1006_s18 = smov 0   ;;  %s1008_s19 = smov 0  }
   0x5   :  { %s1010_s20 = smov 0   ;;  %s1012_s21 = smov 0  }
   0x6 LB: > { %s1027_s22 = sadd.s32 4294967295, %s961_s21   ;;  %s642_s23 = sadd.s32 4294967294, %s961_s21   ;;  %s961_s21 = sphi %s1012_s21, %s1235_s21   ;;  %s957_s20 = sphi %s1010_s20, %s1234_s20   ;;  %s953_s19 = sphi %s1008_s19, %s1233_s19   ;;  %s949_s18 = sphi %s1006_s18, %s1232_s18  }
   0x7   : > { %p42_p0 = scmp.ne.s32.totalorder %s953_s19, %s949_s18  ;;  %p1214_p1 = scmp.eq.s32.totalorder %s1027_s22, 0 }
   0x8   : > { %p156_p3 = scmp.eq.s32.totalorder %s642_s23, 1  ;;  %p643_p5 = scmp.ge.s32.totalorder %s961_s21, 1 }
   0x9   : > { %p1036_p4 = por %p1214_p1, %p42_p0  ;;  %p163_p7 = scmp.lt.s32.totalorder %s961_s21, 3 }
   0xa   : > { %p1041_p6 = por %p156_p3, %p42_p0  ;;  %s963_s27 = smov [#allocation5]  }
   0xb   : > { %s1218_s24 = scalar_select %p1036_p4, 1, 0 }
   0xc   : > { %s1219_s25 = scalar_select %p1041_p6, 1, 0 }
   0xd   : > { %p1046_p8 = pnand %p643_p5, %p163_p7  ;;  %s175_s28 = sshll.u32 %s963_s27, 4  ;;  %s176_s28 = int_to_ptr.vmem [resolvable:$true] %s175_s28 }
   0xe   : > { %s964_s30 = smov [#allocation7]   ;;  %s824_s7 = scalar_lea.vmem %s176_s28, 1280 }
   0xf   : > { %s1220_s26 = scalar_select %p1046_p8, 1, 0 }
  0x10   : > { %p728_p9 = pneg %p1046_p8  ;;  %s191_s6 = sshll.u32 %s964_s30, 4  ;;  %s192_s6 = int_to_ptr.vmem [resolvable:$true] %s191_s6 }
  0x11   : > { %p825_p13 = scmp.ne.s32.totalorder %s176_s28, %s824_s7  ;;  %p832_p5 = scmp.lt.s32.totalorder %s176_s28, %s176_s28 }
  0x12   : > { %p1055_p11 = pnand %p728_p9, %p1214_p1  ;;  %p833_p7 = scmp.lt.s32.totalorder %s824_s7, %s824_s7 }
  0x14   : > { %p815_p12 = pneg %p1055_p11  ;;  %p834_p10 = por %p833_p7, %p832_p5 }
  0x16   : > { %p827_p0 = pnand %p825_p13, %p815_p12 }
  0x18   : > { %p828_p3 = pneg %p827_p0 }
  0x1a   : > { %p835_p9 = pnand %p834_p10, %p828_p3 }
  0x1c   : > { %838 = shalt.err (!%p835_p9)
}
  0x1d   : > { %s965_s8 = smov 64   ;;  %s966_s9 = smov 4  }
  0x1e   : > { %731 = dma.hbm_to_vmem [thread:$0]  (!%p1055_p11), %s1209_s1, 1280, %s176_s28, [#allocation6], %s965_s8, %s965_s8, %s966_s9  }
  0x1f   : > { %s850_s12 = scalar_lea.vmem %s192_s6, 1024  ;;  %p858_p2 = scmp.lt.s32.totalorder %s192_s6, %s192_s6 }
  0x20   : > { %p851_p1 = scmp.ne.s32.totalorder %s192_s6, %s850_s12  ;;  %p859_p6 = scmp.lt.s32.totalorder %s850_s12, %s850_s12 }
  0x22   : > { %p853_p13 = pnand %p851_p1, %p815_p12  ;;  %p860_p5 = por %p859_p6, %p858_p2 }
  0x24   : > { %p854_p0 = pneg %p853_p13 }
  0x26   : > { %p861_p10 = pnand %p860_p5, %p854_p0 }
  0x28   : > { %864 = shalt.err (!%p861_p10)
}
  0x29   : > { %734 = dma.hbm_to_vmem [thread:$0]  (!%p1055_p11), %s1211_s3, 1024, %s192_s6, [#allocation6], %s965_s8, %s965_s8, %s966_s9  }
  0x2a   : > { %s1078_s15 = sadd.s32 1, %s961_s21   ;;  %s29_s16 = sadd.s32 1, %s957_s20 }
  0x2b   : > { %s26_s17 = ssub.s32 %s961_s21, %s1078_s15  ;;  %p36_p1 = scmp.ne.s32.totalorder %s957_s20, %s953_s19 }
  0x2c   : > { %p27_p2 = scmp.eq.s32.totalorder %s26_s17, 0  ;;  %p37_p6 = scmp.eq.s32.totalorder %s961_s21, 0 }
  0x2d   : > { %p1222_p12 = scmp.eq.s32.totalorder %s1027_s22, 1  ;;  %p745_p7 = scmp.lt.s32.totalorder %s961_s21, 2 }
  0x2e   : > { %s1094_s27 = scalar_select %p27_p2, %s957_s20, %s29_s16  }
  0x2f   : > { %p1088_p3 = por %p1222_p12, %p36_p1  ;;  %p38_p9 = por %p37_p6, %p36_p1 }
  0x30   : > { %s208_s28 = sand.u32 1, %s957_s20   ;;  %s685_s30 = sshll.u32 %s961_s21, 8 }
  0x31   : > { %s1223_s23 = scalar_select %p1088_p3, 1, 0 }
  0x32   : > { %s647_s29 = sshll.u32 %s208_s28, 4  ;;  %s1101_s8 = scalar_lea.hbm %s1208_s0, %s685_s30 }
  0x33   : > { %s212_s9 = scalar_lea.vmem [#allocation2], %s647_s29  ;;  %p1105_p11 = pnand %p745_p7, %p38_p9 }
  0x34   : > { %s220_s10 = sshll.u32 %s212_s9, 4  ;;  %s1109_s12 = scalar_lea.sflag [#allocation3], %s208_s28  ;;  %s1103_s10 = int_to_ptr.vmem [resolvable:$true] %s220_s10 }
  0x35   : > { %s865_s13 = scalar_lea.hbm %s1101_s8, 256  ;;  %p867_p0 = pneg %p1105_p11 }
  0x36   : > { %p866_p13 = scmp.ne.s32.totalorder %s1101_s8, %s865_s13  ;;  %s870_s17 = scalar_lea.hbm %s1208_s0, 512 }
  0x37   : > { %p871_p1 = scmp.lt.s32.totalorder %s1101_s8, %s1208_s0  ;;  %p872_p2 = scmp.lt.s32.totalorder %s870_s17, %s865_s13 }
  0x38   : > { %p868_p5 = pnand %p867_p0, %p866_p13 }
  0x39   : > { %p873_p6 = por %p872_p2, %p871_p1 }
  0x3a   : > { %p869_p10 = pneg %p868_p5 }
  0x3c   : > { %p874_p12 = pnand %p873_p6, %p869_p10 }
  0x3e   : > { %877 = shalt.err (!%p874_p12)
}
  0x3f   : > { %s878_s28 = scalar_lea.vmem %s1103_s10, 256  ;;  %s967_s6 = smov [#allocation2]  }
  0x40   : > { %p879_p7 = scmp.ne.s32.totalorder %s1103_s10, %s878_s28  ;;  %s883_s7 = sshll.u32 %s967_s6, 4  ;;  %s884_s7 = int_to_ptr.vmem [resolvable:$false] %s883_s7 }
  0x41   : > { %s885_s9 = scalar_lea.vmem %s884_s7, 512  ;;  %p886_p5 = scmp.lt.s32.totalorder %s1103_s10, %s884_s7 }
  0x42   : > { %p881_p9 = pnand %p879_p7, %p867_p0  ;;  %p887_p3 = scmp.lt.s32.totalorder %s885_s9, %s878_s28 }
  0x44   : > { %p882_p13 = pneg %p881_p9  ;;  %p888_p4 = por %p887_p3, %p886_p5 }
  0x46   : > { %p889_p8 = pnand %p888_p4, %p882_p13 }
  0x48   : > { %892 = shalt.err (!%p889_p8)
}
  0x49   : > { %s968_s13 = smov 128   ;;  %s969_s14 = smov 8  }
  0x4a   : > { %738 = dma.hbm_to_vmem [thread:$0]  (!%p1105_p11), %s1101_s8, 256, %s1103_s10, %s1109_s12, %s968_s13, %s968_s13, %s969_s14  }
  0x4b   : > { %p1225_p0 = scmp.ne.s32.totalorder %s1220_s26, 0 }
  0x4c   : > { %s1133_s16 = sand.u32 (!%p1225_p0), 1, %s953_s19   ;;  %p1226_p4 = scmp.ne.s32.totalorder (!%p1225_p0), %s1218_s24, 0 }
  0x4d   : > { %232 = sbr.rel (%p1225_p0) target bundleno = 543 (0x21f), region = 40  ;;  %s652_s17 = sshll.u32 (!%p1225_p0), %s1133_s16, 4 }
  0x4e   : > { %s235_s29 = scalar_lea.sflag (!%p1225_p0), [#allocation3], %s1133_s16  ;;  %s1139_s30 = scalar_lea.vmem (!%p1225_p0), [#allocation2], %s652_s17 }
  0x52   : > { %936 = dma.done.wait (%p1226_p4), %s235_s29, 256  }
  0x53   : > { %938 = vsyncadd (%p1226_p4), %s235_s29, 4294967040  ;;  %p1227_p8 = scmp.eq.s32.totalorder %s1027_s22, 0 }
  0x55   : > { %940 = dma.done.wait (%p1227_p8), [#allocation6], 2304   ;;  %p1228_p3 = pmov %p1227_p8 }
  0x56   : > { %v970_v0 = vmov 0   ;;  %v971_v1 = vmov 0.0   ;;  %v792_v2 = vld [vmem:[#allocation5 + $0x38] sm:$0xff]   ;;  %v793_v3 = vld [vmem:[#allocation5 + $0x30] sm:$0xff]   ;;  %v794_v4 = vld [vmem:[#allocation5 + $0x28] sm:$0xff]   ;;  %vm374_vm0 = vcmask 261120  }
  0x57   : > { %942 = vsyncadd (%p1228_p3), [#allocation6], 4294964992  ;;  %378 = vmatprep.subr.bf16.mxu0 %v970_v0  ;;  %696 = vmatprep.subr.bf16.mxu1 %v971_v1  ;;  %v795_v5 = vld [vmem:[#allocation5 + $0x20] sm:$0xff]   ;;  %v805_v7 = vld [vmem:[#allocation7 + $0x38] sm:$0xff]   ;;  %vm972_vm1 = vmmov 0   ;;  %s272_s11 = scalar_lea.vmem [#allocation8], %s652_s17 }
  0x58   : > { %379 = vmatpush1.bf16.msra.mxu0 %v792_v2  ;;  %v804_v6 = vld [vmem:[%s1139_s30 + $0x4] ss:$8 sps:$4 sm:$0xff]   ;;  %697 = vmatpush3.bf16.msra.mxu1 %v805_v7  ;;  %v802_v18 = vld [vmem:[%s1139_s30] ss:$8 sps:$4 sm:$0xff]   ;;  %s550_s12 = sshll.u32 %s272_s11, 4  ;;  %s686_s28 = sshll.u32 %s1027_s22, 8  ;;  %s1160_s12 = int_to_ptr.vmem [resolvable:$true] %s550_s12 }
  0x59   : > { %380 = vmatprep.subr.bf16.mxu0 %v970_v0  ;;  %v796_v8 = vld [vmem:[#allocation5 + $0x18] sm:$0xff]   ;;  %669 = vmatprep.mubr.msk.bf16.mxu0 %vm374_vm0, %v804_v6  ;;  %v806_v9 = vld [vmem:[#allocation7 + $0x30] sm:$0xff]   ;;  %v797_v10 = vld [vmem:[#allocation5 + $0x10] sm:$0xff]   ;;  %s1165_s9 = scalar_lea.hbm %s1213_s5, %s686_s28  ;;  %s537_s13 = scalar_lea.sflag [#allocation4], %s1133_s16 }
  0x5a   : > { %698 = vmatprep.subr.bf16.mxu1 %v971_v1  ;;  %v807_v11 = vld [vmem:[#allocation7 + $0x28] sm:$0xff]   ;;  %v798_v12 = vld [vmem:[#allocation5 + $0x8] sm:$0xff]   ;;  %v808_v13 = vld [vmem:[#allocation7 + $0x20] sm:$0xff]   ;;  %712 = vmatprep.mubr.msk.bf16.mxu1 %vm972_vm1, %v971_v1  ;;  %s893_s14 = scalar_lea.vmem %s1160_s12, 256  ;;  %p1229_p10 = scmp.ne.s32.totalorder %s1223_s23, 0 }
  0x5b   : > { %v799_v14 = vld [vmem:[#allocation5] sm:$0xff]   ;;  %v809_v15 = vld [vmem:[#allocation7 + $0x18] sm:$0xff]   ;;  %v811_v20 = vld [vmem:[#allocation7 + $0x8] sm:$0xff]   ;;  %p894_p11 = scmp.ne.s32.totalorder %s1160_s12, %s893_s14  ;;  %s973_s22 = smov [#allocation8]  }
  0x5c   : > { %381 = vmatpush1.bf16.msra.mxu0 %v793_v3  ;;  %699 = vmatpush3.bf16.msra.mxu1 %v806_v9  ;;  %v800_v16 = vld [vmem:[#allocation5 + $0x48] sm:$0xff]   ;;  %v801_v17 = vld [vmem:[#allocation5 + $0x40] sm:$0xff]   ;;  %v812_v21 = vld [vmem:[#allocation7] sm:$0xff]   ;;  %s897_s17 = sshll.u32 %s973_s22, 4  ;;  %s898_s17 = int_to_ptr.vmem [resolvable:$false] %s897_s17 }
  0x5d   : > { %382 = vmatprep.subr.bf16.mxu0 %v970_v0  ;;  %700 = vmatprep.subr.bf16.mxu1 %v971_v1  ;;  %v810_v19 = vld [vmem:[#allocation7 + $0x10] sm:$0xff]   ;;  %p895_p1 = pnand %p894_p11, %p1229_p10  ;;  %s899_s29 = scalar_lea.vmem %s898_s17, 512 }
  0x5e   : > { %v656_v22 = vld [vmem:[%s1210_s2] ss:$0 sm:$0xff]  ;;  %p900_p6 = scmp.lt.s32.totalorder %s1160_s12, %s898_s17  ;;  %p901_p12 = scmp.lt.s32.totalorder %s899_s29, %s893_s14 }
  0x5f   : > { %v670_v32 = vld [vmem:[%s1212_s4] ss:$0 sm:$0xff]  ;;  %p896_p2 = pneg %p895_p1 }
  0x60   : > { %383 = vmatpush1.bf16.msra.mxu0 %v794_v4  ;;  %701 = vmatpush3.bf16.msra.mxu1 %v807_v11  ;;  %p902_p7 = por %p901_p12, %p900_p6 }
  0x61   : > { %384 = vmatprep.subr.bf16.mxu0 %v970_v0  ;;  %702 = vmatprep.subr.bf16.mxu1 %v971_v1 }
  0x62   : > { %p903_p9 = pnand %p902_p7, %p896_p2 }
  0x64   : > { %385 = vmatpush1.bf16.msra.mxu0 %v795_v5  ;;  %703 = vmatpush3.bf16.msra.mxu1 %v808_v13 }
  0x65   : > { %386 = vmatprep.subr.bf16.mxu0 %v970_v0  ;;  %704 = vmatprep.subr.bf16.mxu1 %v971_v1 }
  0x68   : > { %387 = vmatpush1.bf16.msra.mxu0 %v796_v8  ;;  %705 = vmatpush3.bf16.msra.mxu1 %v809_v15 }
  0x69   : > { %388 = vmatprep.subr.bf16.mxu0 %v970_v0  ;;  %706 = vmatprep.subr.bf16.mxu1 %v971_v1 }
  0x6c   : > { %389 = vmatpush1.bf16.msra.mxu0 %v797_v10  ;;  %707 = vmatpush3.bf16.msra.mxu1 %v810_v19 }
  0x6d   : > { %390 = vmatprep.subr.bf16.mxu0 %v970_v0  ;;  %708 = vmatprep.subr.bf16.mxu1 %v971_v1 }
  0x70   : > { %391 = vmatpush1.bf16.msra.mxu0 %v798_v12  ;;  %709 = vmatpush3.bf16.msra.mxu1 %v811_v20 }
  0x71   : > { %392 = vmatprep.subr.bf16.mxu0 %v970_v0  ;;  %710 = vmatprep.subr.bf16.mxu1 %v971_v1 }
  0x74   : > { %393 = vmatpush1.bf16.msra.mxu0 %v799_v14  ;;  %711 = vmatpush3.bf16.msra.mxu1 %v812_v21 }
  0x75   : > { %406 = vmatprep.subr.bf16.mxu0 %v970_v0 }
  0x78   : > { %407 = vmatpush2.bf16.msra.mxu0 %v800_v16 }
  0x79   : > { %408 = vmatprep.subr.bf16.mxu0 %v970_v0 }
  0x7c   : > { %409 = vmatpush2.bf16.msra.mxu0 %v801_v17 }
  0x7f   : > { %411 = vmatmul.mubr.bf16.vlgmr.msra.gmra.mxu0 %v802_v18 }
 0x13f   : > { %v412_v23 = vpop.f32.mrf.mxu0 }
 0x140   : > { %v413_v25 = vadd.f32 %v656_v22, %v412_v23 }
 0x141   : > { %v414_v24 = vpop.f32.mrf.mxu0 }
 0x142   : > { %v419_v29 = vmax.f32 %v413_v25, 0.0 }
 0x143   : > { %v415_v26 = vpop.f32.mrf.mxu0 }
 0x144   : > { %v416_v27 = vadd.f32 %v656_v22, %v415_v26 }
 0x145   : > { %v417_v28 = vpop.f32.mrf.mxu0 }
 0x146   : > { %v420_v30 = vmax.f32 %v416_v27, 0.0 }
 0x148   : > { %v421_v31 = vpack.c.bf16 %v420_v30, %v419_v29 }
 0x14a   : > { %713 = vmatmul.mubr.bf16.vlgmr.msra.gmra.mxu1 %v421_v31 }
 0x20a   : > { %v527_v33 = vpop.f32.mrf.mxu1 }
 0x20b   : > { %v528_v34 = vadd.f32 %v670_v32, %v527_v33 }
 0x20c   : > { %v714_v35 = vpop.f32.mrf.mxu1 }
 0x20d   : > { %534 = vst [vmem:[%s272_s11] sm:$0xff] %v528_v34 }
 0x20e   : > { %v530_v36 = vpop.f32.mrf.mxu1 }
 0x20f   : > { %v531_v37 = vadd.f32 %v670_v32, %v530_v36 }
 0x210   : > { %v715_v38 = vpop.f32.mrf.mxu1 }
 0x211   : > { %535 = vst [vmem:[%s272_s11 + $0x8] sm:$0xff] %v531_v37 }
 0x212   : > { %906 = shalt.err (!%p903_p9)
}
 0x213   : > { %s907_s30 = scalar_lea.hbm %s1165_s9, 256  ;;  %s911_s8 = scalar_lea.hbm %s1213_s5, 512 }
 0x214   : > { %p908_p13 = scmp.ne.s32.totalorder %s1165_s9, %s907_s30  ;;  %p912_p4 = scmp.lt.s32.totalorder %s1165_s9, %s1213_s5 }
 0x215   : > { %p913_p8 = scmp.lt.s32.totalorder %s911_s8, %s907_s30 }
 0x216   : > { %p909_p5 = pnand %p908_p13, %p1229_p10 }
 0x217   : > { %p914_p3 = por %p913_p8, %p912_p4 }
 0x218   : > { %p910_p0 = pneg %p909_p5 }
 0x21a   : > { %p915_p11 = pnand %p914_p3, %p910_p0 }
 0x21c   : > { %918 = shalt.err (!%p915_p11)
}
 0x21d   : > { %s974_s28 = smov 128   ;;  %s975_s6 = smov 8  }
 0x21e   : > { %726 = dma.vmem_to_hbm [thread:$0]  (%p1229_p10), %s1160_s12, 256, %s1165_s9, %s537_s13, %s974_s28, %s974_s28, %s975_s6  }
 0x21f PF: > { %s565_s7 = sand.u32 1, %s949_s18   ;;  %p1230_p1 = scmp.ne.s32.totalorder %s1219_s25, 0 }
 0x220   : > { %p1231_p2 = scmp.ge.s32.totalorder %s961_s21, 2  ;;  %s566_s14 = scalar_lea.sflag [#allocation4], %s565_s7 }
 0x222   : > { %p740_p6 = pnand %p1231_p2, %p1230_p1 }
 0x224   : > { %p741_p12 = pneg %p740_p6 }
 0x226   : > { %944 = dma.done.wait (%p741_p12), %s566_s14, 256  }
 0x227   : > { %946 = vsyncadd (%p741_p12), %s566_s14, 4294967040  ;;  %p19_p7 = scmp.ge.s32.totalorder %s1078_s15, 4   ;;  %s1232_s18 = smov %s953_s19 }
 0x228   : > { %s1233_s19 = smov %s957_s20  ;;  %s1234_s20 = smov %s1094_s27 }
 0x229   : > { %s1235_s21 = smov %s1078_s15  ;;  %21 = sbr.rel (!%p19_p7) target bundleno = 6 (0x6), region = 93 }
 0x22e   :  { %571 = vsyncpa [#allocation3], 1 }
 0x22f   :  { %573 = vsyncpa [#allocation3 + $0x1], 1 }
 0x230   :  { %574 = vsyncpa [#allocation6], 1 }
 0x231   :  { %575 = vsyncpa [#allocation4], 1 }
 0x232   :  { %577 = vsyncpa [#allocation4 + $0x1], 1 }

</bundles_post_ra>
